<compile_context>
chip_gen: v6e
topology: v6e:2x2x1
jax: 0.10.0
libtpu: 0.0.40
codegen_flags: <defaults>
</compile_context>

<pallas_src>
import numpy as np
import jax
import jax.numpy as jnp
from jax import lax
from jax.experimental import pallas as pl
from jax.experimental.pallas import tpu as pltpu


def _logit_head_kernel(scale_ref, x_ref, w_ref, b_ref, o_ref):
    """Computes one (tm, tn) output tile.

    scale_ref : SMEM (1,) f32   -- exp(logit_scale), scalar-prefetched
    x_ref     : VMEM (tm, D)    -- raw (un-normalized) input rows, native dtype
    w_ref     : VMEM (tn, D)    -- head weight tile in PyTorch [C, D] layout
    b_ref     : VMEM (1, tn) f32-- bias * exp(logit_scale), pre-folded
    o_ref     : VMEM (tm, tn)   -- output tile
    """
    x = x_ref[...]                                      # keep native dtype (bf16 path)

    # L2-norm factor: only the reduction is upcast to f32.
    xf = x.astype(jnp.float32)
    sumsq = jnp.sum(xf * xf, axis=1, keepdims=True)     # (tm, 1) f32
    # 1 / max(||x||, 1e-12) == rsqrt(max(sum x^2, 1e-24))  (matches F.normalize eps)
    inv_norm = lax.rsqrt(jnp.maximum(sumsq, 1e-24))

    # (x/||x||) @ W^T == diag(1/||x||) (x @ W^T): matmul raw x on the MXU
    # (bf16 x bf16 -> f32 native path), contracting on D with no transpose.
    acc = lax.dot_general(
        x, w_ref[...],
        dimension_numbers=(((1,), (1,)), ((), ())),
        preferred_element_type=jnp.float32)             # (tm, tn) f32

    scale = inv_norm * scale_ref[0]                     # fold exp(logit_scale) per row
    o_ref[...] = (acc * scale + b_ref[...]).astype(o_ref.dtype)


def _round_up(v, m):
    return ((v + m - 1) // m) * m


def _select_tiles(b_pad, c_pad, d, in_bytes, out_bytes,
                  budget_bytes=24 * 1024 * 1024):
    """Largest (tm, tn) that divide the padded extents and fit the VMEM budget."""
    tn_cands = [c for c in (512, 384, 256, 128) if c_pad % c == 0]
    tm_cands = [c for c in (512, 256, 128, 64, 32, 16, 8) if b_pad % c == 0]

    def footprint(tm, tn):
        # double-buffered inputs + double-buffered output tile
        return (2 * tm * d * in_bytes + 2 * tn * d * in_bytes
                + 2 * tn * 4 + 2 * tm * tn * out_bytes)

    for tn in tn_cands:                # prioritize a wide (weight/output) tile
        for tm in tm_cands:
            if footprint(tm, tn) <= budget_bytes:
                return tm, tn
    return tm_cands[-1], tn_cands[-1]


def logit_head(x, weight, bias, logit_scale):
    """x: [B, D]; weight: PyTorch layout [C, D]; bias: [C]; logit_scale: float."""
    B, D = x.shape
    C = weight.shape[0]
    # TODO(synk): if D ever outgrows a single VMEM tile, add an "arbitrary" K grid
    # axis with an f32 VMEM accumulator and pl.when(k == 0) init; D is kept whole
    # here (the recommended path for typical head feature sizes).

    exp_s = jnp.exp(jnp.float32(logit_scale))               # precomputed in wrapper
    scale_arr = exp_s.reshape(1)                            # -> SMEM scalar prefetch
    bias_scaled = bias.astype(jnp.float32) * exp_s          # fold exp(s) into bias

    # Pad B to a sublane multiple and C to a lane multiple (lane-dense stores).
    B_pad = _round_up(B, 8)
    C_pad = _round_up(C, 128)
    tm, tn = _select_tiles(B_pad, C_pad, D,
                           x.dtype.itemsize, x.dtype.itemsize)

    x_p = x if B_pad == B else jnp.pad(x, ((0, B_pad - B), (0, 0)))
    w_p = weight if C_pad == C else jnp.pad(weight, ((0, C_pad - C), (0, 0)))
    b_p = (bias_scaled if C_pad == C
           else jnp.pad(bias_scaled, (0, C_pad - C))).reshape(1, C_pad)

    nc, nb = C_pad // tn, B_pad // tm
    grid_spec = pltpu.PrefetchScalarGridSpec(
        num_scalar_prefetch=1,
        # C-tile index j is the OUTER axis: the (tn, D) weight tile stays
        # resident across all inner B tiles; only the small x tile is re-fetched.
        grid=(nc, nb),
        in_specs=[
            pl.BlockSpec((tm, D), lambda j, i, s: (i, 0)),   # x rows
            pl.BlockSpec((tn, D), lambda j, i, s: (j, 0)),   # weight tile [C, D]
            pl.BlockSpec((1, tn), lambda j, i, s: (0, j)),   # pre-scaled bias
        ],
        out_specs=pl.BlockSpec((tm, tn), lambda j, i, s: (i, j)),
    )

    out = pl.pallas_call(
        _logit_head_kernel,
        out_shape=jax.ShapeDtypeStruct((B_pad, C_pad), x.dtype),
        grid_spec=grid_spec,
        compiler_params=pltpu.CompilerParams(
            dimension_semantics=("parallel", "parallel"),
            vmem_limit_bytes=48 * 1024 * 1024),
    )(scale_arr, x_p, w_p, b_p)
    return out[:B, :C]


def logit_head_ref(x, weight, bias, logit_scale):
    """Pure-JAX f32 reference of the PyTorch forward."""
    xf = x.astype(jnp.float32)
    norm = jnp.sqrt(jnp.sum(xf * xf, axis=1, keepdims=True))
    xn = xf / jnp.maximum(norm, 1e-12)
    y = xn @ weight.astype(jnp.float32).T + bias.astype(jnp.float32)
    return y * jnp.exp(jnp.float32(logit_scale))


if __name__ == "__main__":
    # Small shapes that still exercise padding (B=22 -> 24, C=600 -> 640) and a
    # real (nc=5, nb=3) grid.  head = nn.Linear(D, C), batch of B feature rows.
    B, D, C = 22, 64, 600
    key = jax.random.PRNGKey(0)
    kx, kw, kb = jax.random.split(key, 3)

    x = jax.random.normal(kx, (B, D), dtype=jnp.float32).astype(jnp.bfloat16)
    weight = (jax.random.normal(kw, (C, D), dtype=jnp.float32)
              * (1.0 / np.sqrt(D))).astype(jnp.bfloat16)
    bias = jax.random.normal(kb, (C,), dtype=jnp.float32) * 0.01
    logit_scale = float(np.log(1.0 / 0.07))

    out = jax.block_until_ready(logit_head(x, weight, bias, logit_scale))
    ref = jax.block_until_ready(logit_head_ref(x, weight, bias, logit_scale))

    assert out.shape == (B, C), out.shape
    np.testing.assert_allclose(np.asarray(out, dtype=np.float32),
                               np.asarray(ref, dtype=np.float32),
                               rtol=5e-2, atol=5e-2)
    print("KERNEL_OK")
</pallas_src>

<mosaic_0001>
module attributes {stable_mosaic.version = 11 : i64} {
  func.func @_logit_head_kernel(%arg0: i32, %arg1: i32, %arg2: memref<1xf32, #tpu.memory_space<smem>>, %arg3: memref<8x64xbf16, #tpu.memory_space<vmem>>, %arg4: memref<128x64xbf16, #tpu.memory_space<vmem>>, %arg5: memref<1x128xf32, #tpu.memory_space<vmem>>, %arg6: memref<8x128xbf16, #tpu.memory_space<vmem>>) attributes {dimension_semantics = [#tpu.dimension_semantics<parallel>, #tpu.dimension_semantics<parallel>], iteration_bounds = array<i64: 5, 3>, scalar_prefetch = 1 : i64, scratch_operands = 0 : i64, tpu.core_type = #tpu.core_type<tc>, window_params = [{transform_indices = @transform_0, window_bounds = array<i64: 8, 64>}, {transform_indices = @transform_1, window_bounds = array<i64: 128, 64>}, {transform_indices = @transform_2, window_bounds = array<i64: 1, 128>}, {transform_indices = @transform_3, window_bounds = array<i64: 8, 128>}]} {
    %c0 = arith.constant 0 : index
    %c0_0 = arith.constant 0 : index
    %0 = vector.load %arg3[%c0, %c0_0] : memref<8x64xbf16, #tpu.memory_space<vmem>>, vector<8x64xbf16>
    %1 = arith.extf %0 : vector<8x64xbf16> to vector<8x64xf32>
    %2 = arith.mulf %1, %1 : vector<8x64xf32>
    %cst = arith.constant dense<0.000000e+00> : vector<8xf32>
    %3 = vector.multi_reduction <add>, %2, %cst [1] : vector<8x64xf32> to vector<8xf32>
    %4 = vector.shape_cast %3 : vector<8xf32> to vector<8x1xf32>
    %cst_1 = arith.constant 1.000000e-24 : f32
    %5 = vector.broadcast %cst_1 : f32 to vector<8x1xf32>
    %6 = arith.maximumf %4, %5 : vector<8x1xf32>
    %7 = math.rsqrt %6 : vector<8x1xf32>
    %c0_2 = arith.constant 0 : index
    %c0_3 = arith.constant 0 : index
    %8 = vector.load %arg4[%c0_2, %c0_3] : memref<128x64xbf16, #tpu.memory_space<vmem>>, vector<128x64xbf16>
    %cst_4 = arith.constant dense<0.000000e+00> : vector<8x128xf32>
    %9 = tpu.matmul %0, %8, %cst_4 {dimension_numbers = #tpu.dot_dimension_numbers<[1], [1], [0], [0], [0, 0, 1, 0], [], []>} : vector<8x64xbf16>, vector<128x64xbf16>, vector<8x128xf32> -> vector<8x128xf32>
    %c0_5 = arith.constant 0 : index
    %10 = memref.load %arg2[%c0_5] : memref<1xf32, #tpu.memory_space<smem>>
    %11 = vector.broadcast %10 : f32 to vector<8x1xf32>
    %12 = arith.mulf %7, %11 : vector<8x1xf32>
    %13 = vector.broadcast %12 : vector<8x1xf32> to vector<8x128xf32>
    %14 = arith.mulf %9, %13 : vector<8x128xf32>
    %c0_6 = arith.constant 0 : index
    %c0_7 = arith.constant 0 : index
    %15 = vector.load %arg5[%c0_6, %c0_7] : memref<1x128xf32, #tpu.memory_space<vmem>>, vector<1x128xf32>
    %16 = vector.broadcast %15 : vector<1x128xf32> to vector<8x128xf32>
    %17 = arith.addf %14, %16 : vector<8x128xf32>
    %18 = arith.truncf %17 : vector<8x128xf32> to vector<8x128xbf16>
    %c0_8 = arith.constant 0 : index
    %c0_9 = arith.constant 0 : index
    %19 = vector.load %arg6[%c0_8, %c0_9] : memref<8x128xbf16, #tpu.memory_space<vmem>>, vector<8x128xbf16>
    tpu.vector_store %arg6[%c0_8, %c0_9], %18 {strides = array<i32>} : memref<8x128xbf16, #tpu.memory_space<vmem>>, vector<8x128xbf16>,
    return
  }
  func.func @transform_0(%arg0: i32, %arg1: i32, %arg2: memref<1xf32, #tpu.memory_space<smem>>) -> (i32, i32) {
    %c0_i32 = arith.constant 0 : i32
    %c0_i32_0 = arith.constant 0 : i32
    return %arg1, %c0_i32 : i32, i32
  }
  func.func @transform_1(%arg0: i32, %arg1: i32, %arg2: memref<1xf32, #tpu.memory_space<smem>>) -> (i32, i32) {
    %c0_i32 = arith.constant 0 : i32
    %c0_i32_0 = arith.constant 0 : i32
    return %arg0, %c0_i32 : i32, i32
  }
  func.func @transform_2(%arg0: i32, %arg1: i32, %arg2: memref<1xf32, #tpu.memory_space<smem>>) -> (i32, i32) {
    %c0_i32 = arith.constant 0 : i32
    %c0_i32_0 = arith.constant 0 : i32
    return %c0_i32, %arg0 : i32, i32
  }
  func.func @transform_3(%arg0: i32, %arg1: i32, %arg2: memref<1xf32, #tpu.memory_space<smem>>) -> (i32, i32) {
    %c0_i32 = arith.constant 0 : i32
    return %arg1, %arg0 : i32, i32
  }
}

</mosaic_0001>

<bundles_post_ra>
// kernel: tpu_custom_call.1
= control target key start
LH: loop header
LB: loop body
LE: loop exit
PB: predicated region body
PF: predicated region fallthrough
CT: control target
= control target key end

     0   :  { %s892_s0 = inlined_call_operand.<no memory space> [shape: f32[1], index: 0, kind: input, shape index: {}]   ;;  %s893_s1 = inlined_call_operand.vmem [shape: bf16[24,64], index: 1, kind: input, shape index: {}]   ;;  %s894_s2 = inlined_call_operand.vmem [shape: bf16[640,64], index: 2, kind: input, shape index: {}]   ;;  %s895_s3 = inlined_call_operand.vmem [shape: f32[1,640], index: 3, kind: input, shape index: {}]   ;;  %s896_s4 = inlined_call_operand.hbm [shape: bf16[24,640], index: 4, kind: output, shape index: {}]  }
   0x1   :  { %9 = sst [smem:[#allocation3]] %s892_s0 }
   0x2   :  { %10 = vsyncpa [#allocation5], 0 }
   0x3   :  { %12 = vsyncpa [#allocation5 + $0x1], 0  ;;  %s735_s17 = smov 0   ;;  %s737_s18 = smov 0  }
   0x4   :  { %s739_s19 = smov 0   ;;  %s741_s20 = smov 0  }
   0x5   :  { %s743_s21 = smov 0   ;;  %s745_s22 = smov 0  }
   0x6   :  { %s747_s23 = smov 0   ;;  %s749_s24 = smov 0  }
   0x7 LB: > { %s474_s0 = sadd.s32 4294967295, %s702_s24   ;;  %s475_s25 = sadd.s32 4294967294, %s702_s24   ;;  %s702_s24 = sphi %s749_s24, %s18_s24   ;;  %s698_s23 = sphi %s747_s23, %s905_s23   ;;  %s694_s22 = sphi %s745_s22, %s904_s22   ;;  %s690_s21 = sphi %s743_s21, %s903_s21   ;;  %s686_s20 = sphi %s741_s20, %s902_s20   ;;  %s682_s19 = sphi %s739_s19, %s901_s19   ;;  %s678_s18 = sphi %s737_s18, %s900_s18   ;;  %s674_s17 = sphi %s735_s17, %s899_s17  }
   0x8   : > { %s27_s26 = sadd.s32 1, %s694_s22  ;;  %s30_s27 = sadd.s32 1, %s698_s23 }
   0x9   : > { %p28_p0 = scmp.ge.s32.totalorder %s27_s26, 3  ;;  %p127_p1 = scmp.ne.s32.totalorder %s682_s19, %s678_s18 }
   0xa   : > { %p128_p2 = scmp.eq.s32.totalorder %s474_s0, 14  ;;  %p133_p5 = scmp.ne.s32.totalorder %s678_s18, %s674_s17 }
   0xb   : > { %s907_s26 = smov (%p28_p0, %s27_s26), 0  ;;  %s909_s27 = smov (!%p28_p0, %s30_s27), %s698_s23 }
   0xc   : > { %s112_s28 = ssub.s32 %s694_s22, %s907_s26  ;;  %p786_p3 = por %p128_p2, %p127_p1 }
   0xd   : > { %p32_p4 = scmp.ge.s32.totalorder %s909_s27, 5  ;;  %p134_p6 = scmp.eq.s32.totalorder %s475_s25, 14 }
   0xe   : > { %p478_p7 = scmp.ge.s32.totalorder %s702_s24, 1  ;;  %p174_p9 = scmp.lt.s32.totalorder %s702_s24, 16 }
   0xf   : > { %s911_s27 = smov (%p32_p4, %s909_s27), 0  ;;  %p795_p8 = por %p134_p6, %p133_p5 }
  0x10   : > { %s113_s5 = ssub.s32 %s698_s23, %s911_s27  ;;  %s117_s6 = sadd.s32 1, %s682_s19 }
  0x11   : > { %s114_s7 = sor.u32 %s113_s5, %s112_s28  ;;  %p175_p10 = pnand %p478_p7, %p174_p9 }
  0x12   : > { %p115_p11 = scmp.eq.s32.totalorder %s114_s7, 0  ;;  %s481_s9 = sshll.u32 (!%p175_p10), %s690_s21, 4 }
  0x13   : > { %178 = sbr.rel (%p175_p10) target bundleno = 305 (0x131), region = 32  ;;  %p205_p12 = scmp.lt.s32.totalorder (!%p175_p10), %s686_s20, 2 }
  0x14   : > { %s804_s8 = scalar_select %p115_p11, %s682_s19, %s117_s6  }
  0x15   : > { %p210_p13 = scmp.lt.s32.totalorder (!%p175_p10), %s481_s9, 79  ;;  %s351_s28 = sld [smem:[#allocation3]] (!%p175_p10) }
  0x16   : > { %p215_p0 = scmp.lt.s32.totalorder (!%p175_p10), %s690_s21, 4  ;;  %s202_s6 = sand.u32 (!%p175_p10), 1, %s678_s18  }
  0x17   : > { %s526_s7 = smul.u32 (!%p175_p10), 5, %s686_s20 }
  0x18   : > { %v704_v0 = vmov 0.0   ;;  %vm705_vm0 = vmmov 0   ;;  %s206_s10 = scalar_select %p205_p12, %s686_s20, 2  ;;  %vm222_vm1 = vcmask 523264  }
  0x19   : > { %506 = vmatprep.subr.bf16.mxu0 %v704_v0  ;;  %522 = vmatprep.mubr.msk.bf16.mxu0 %vm705_vm0, %v704_v0  ;;  %s913_s9 = smov (!%p210_p13, %s481_s9), 79  ;;  %s377_s13 = sadd.s32 %s690_s21, %s526_s7 }
  0x1a   : > { %s480_s11 = sshll.u32 %s206_s10, 2  ;;  %s482_s12 = sshll.u32 %s913_s9, 2 }
  0x1b   : > { %s208_s15 = scalar_lea.vmem %s893_s1, %s480_s11  ;;  %s815_s25 = scalar_lea.vmem %s894_s2, %s482_s12  ;;  %v352_v24 = vstv %s351_s28 }
  0x1c   : > { %v219_v1 = vld [vmem:[%s208_s15] sm:$0xf]  ;;  %v600_v2 = vld [vmem:[%s815_s25 + $0x38] sm:$0xff]   ;;  %v601_v5 = vld [vmem:[%s815_s25 + $0x30] sm:$0xff]   ;;  %s216_s5 = scalar_select %p215_p0, %s690_s21, 4 }
  0x1d   : > { %v220_v3 = vunpack.c.l.bf16 %v219_v1  ;;  %v309_v4 = vsel %vm222_vm1, %v600_v2, 0  ;;  %v306_v7 = vsel %vm222_vm1, %v601_v5, 0  ;;  %v602_v9 = vld [vmem:[%s815_s25 + $0x28] sm:$0xff]   ;;  %v603_v11 = vld [vmem:[%s815_s25 + $0x20] sm:$0xff]   ;;  %v604_v13 = vld [vmem:[%s815_s25 + $0x18] sm:$0xff]   ;;  %s479_s9 = sshll.u32 %s202_s6, 2 }
  0x1e   : > { %507 = vmatpush3.bf16.xpose.msra.mxu0 %v309_v4  ;;  %v303_v10 = vsel %vm222_vm1, %v602_v9, 0  ;;  %v300_v12 = vsel %vm222_vm1, %v603_v11, 0  ;;  %v297_v14 = vsel %vm222_vm1, %v604_v13, 0  ;;  %v605_v15 = vld [vmem:[%s815_s25 + $0x10] sm:$0xff]   ;;  %v606_v17 = vld [vmem:[%s815_s25 + $0x8] sm:$0xff]   ;;  %v607_v19 = vld [vmem:[%s815_s25] sm:$0xff]   ;;  %s217_s12 = scalar_lea.vmem %s895_s3, %s216_s5 }
  0x1f   : > { %508 = vmatprep.subr.bf16.mxu0 %v704_v0  ;;  %v221_v6 = vmul.f32 %v220_v3, %v220_v3  ;;  %v294_v16 = vsel %vm222_vm1, %v605_v15, 0  ;;  %v291_v18 = vsel %vm222_vm1, %v606_v17, 0  ;;  %v288_v20 = vsel %vm222_vm1, %v607_v19, 0  ;;  %v492_v27 = vld [vmem:[%s217_s12] ss:$0 sm:$0xff]  ;;  %s494_s14 = sshll.u32 %s377_s13, 6 }
  0x20   : > { %s204_s15 = scalar_lea.vmem [#allocation4], %s479_s9  ;;  %s846_s25 = scalar_lea.hbm %s896_s4, %s494_s14 }
  0x21   : > { %v223_v8 = vsel %vm222_vm1, %v221_v6, 0.0  ;;  %s381_s16 = sshll.u32 %s204_s15, 4  ;;  %s366_s21 = scalar_lea.sflag [#allocation5], %s202_s6  ;;  %s382_s16 = int_to_ptr.vmem [resolvable:$true] %s381_s16 }
  0x22   : > { %224 = vadd.xlane.f32.xlu0 %v223_v8  ;;  %s610_s28 = scalar_lea.vmem %s382_s16, 64  ;;  %s706_s5 = smov [#allocation4]  }
  0x23   : > { %p611_p1 = scmp.ne.s32.totalorder %s382_s16, %s610_s28  ;;  %s614_s7 = sshll.u32 %s706_s5, 4  ;;  %s615_s7 = int_to_ptr.vmem [resolvable:$false] %s614_s7 }
  0x24   : > { %s616_s9 = scalar_lea.vmem %s615_s7, 128  ;;  %p617_p5 = scmp.lt.s32.totalorder %s382_s16, %s615_s7 }
  0x25   : > { %p612_p2 = pnand %p611_p1, %p786_p3  ;;  %p618_p6 = scmp.lt.s32.totalorder %s616_s9, %s610_s28 }
  0x26   : > { %509 = vmatpush3.bf16.xpose.msra.mxu0 %v306_v7 }
  0x27   : > { %510 = vmatprep.subr.bf16.mxu0 %v704_v0  ;;  %p613_p4 = pneg %p612_p2  ;;  %p619_p7 = por %p618_p6, %p617_p5 }
  0x29   : > { %p620_p9 = pnand %p619_p7, %p613_p4 }
  0x2e   : > { %511 = vmatpush3.bf16.xpose.msra.mxu0 %v303_v10 }
  0x2f   : > { %512 = vmatprep.subr.bf16.mxu0 %v704_v0 }
  0x36   : > { %513 = vmatpush3.bf16.xpose.msra.mxu0 %v300_v12 }
  0x37   : > { %514 = vmatprep.subr.bf16.mxu0 %v704_v0 }
  0x3e   : > { %515 = vmatpush3.bf16.xpose.msra.mxu0 %v297_v14 }
  0x3f   : > { %516 = vmatprep.subr.bf16.mxu0 %v704_v0 }
  0x46   : > { %517 = vmatpush3.bf16.xpose.msra.mxu0 %v294_v16 }
  0x47   : > { %518 = vmatprep.subr.bf16.mxu0 %v704_v0 }
  0x4e   : > { %519 = vmatpush3.bf16.xpose.msra.mxu0 %v291_v18 }
  0x4f   : > { %520 = vmatprep.subr.bf16.mxu0 %v704_v0 }
  0x56   : > { %521 = vmatpush3.bf16.xpose.msra.mxu0 %v288_v20 }
  0x5d   : > { %523 = vmatmul.mubr.msk.bf16.vlgmr.msra.gmra.mxu0 %vm222_vm1, %v219_v1 }
  0xab   : > { %v225_v21 = vpop.xlane.xlu0 %224 }
  0xac   : > { %v226_v22 = vmax.f32 %v225_v21, 1e-24 }
  0xae   : > { %608 = vrsqrt.f32 %v226_v22 }
  0xbb   : > { %v609_v23 = vpop.eup %608 }
  0xbc   : > { %v353_v25 = vmul.f32 %v609_v23, %v352_v24 }
 0x11d   : > { %v345_v26 = vpop.f32.mrf.mxu0 }
 0x11e   : > { %v354_v28 = vmul.f32 %v353_v25, %v345_v26 }
 0x11f   : > { %v524_v29 = vpop.f32.mrf.mxu0 }
 0x120   : > { %v362_v30 = vadd.f32 %v492_v27, %v354_v28 }
 0x121   : > { %v348_v31 = vpop.f32.mrf.mxu0 }
 0x122   : > { %v363_v32 = vpack.c.bf16 %v362_v30, %v362_v30 }
 0x123   : > { %v525_v33 = vpop.f32.mrf.mxu0 }
 0x124   : > { %364 = vst [vmem:[%s204_s15] sm:$0xf] %v363_v32 }
 0x125   : > { %623 = shalt.err (!%p620_p9)
}
 0x126   : > { %s624_s10 = scalar_lea.hbm %s846_s25, 64  ;;  %s628_s12 = scalar_lea.hbm %s896_s4, 960 }
 0x127   : > { %p625_p10 = scmp.ne.s32.totalorder %s846_s25, %s624_s10  ;;  %p629_p13 = scmp.lt.s32.totalorder %s846_s25, %s896_s4 }
 0x128   : > { %p630_p0 = scmp.lt.s32.totalorder %s628_s12, %s624_s10 }
 0x129   : > { %p626_p11 = pnand %p625_p10, %p786_p3 }
 0x12a   : > { %p631_p1 = por %p630_p0, %p629_p13 }
 0x12b   : > { %p627_p12 = pneg %p626_p11 }
 0x12d   : > { %p632_p2 = pnand %p631_p1, %p627_p12 }
 0x12f   : > { %635 = shalt.err (!%p632_p2)
}
 0x130   : > { %527 = dma.vmem_to_hbm [thread:$0]  (%p786_p3), %s382_s16, 64, %s846_s25, %s366_s21  }
 0x131 PF: > { %p533_p4 = scmp.ge.s32.totalorder %s702_s24, 2  ;;  %s393_s15 = sand.u32 1, %s674_s17  }
 0x132   : > { %s394_s0 = scalar_lea.sflag [#allocation5], %s393_s15 }
 0x133   : > { %p530_p5 = pnand %p533_p4, %p795_p8 }
 0x135   : > { %p531_p6 = pneg %p530_p5 }
 0x137   : > { %669 = dma.done.wait (%p531_p6), %s394_s0, 64  }
 0x138   : > { %671 = vsyncadd (%p531_p6), %s394_s0, 4294967232  ;;  %s18_s24 = sadd.s32 1, %s702_s24   ;;  %s899_s17 = smov %s678_s18 }
 0x139   : > { %p15_p7 = scmp.ge.s32.totalorder %s18_s24, 17   ;;  %s900_s18 = smov %s682_s19 }
 0x13a   : > { %s901_s19 = smov %s804_s8  ;;  %s902_s20 = smov %s694_s22 }
 0x13b   : > { %s903_s21 = smov %s698_s23  ;;  %s904_s22 = smov %s907_s26 }
 0x13c   : > { %s905_s23 = smov %s911_s27  ;;  %17 = sbr.rel (!%p15_p7) target bundleno = 7 (0x7), region = 73 }
 0x141   :  { %399 = vsyncpa [#allocation5], 1 }
 0x142   :  { %401 = vsyncpa [#allocation5 + $0x1], 1 }

</bundles_post_ra>
